<compile_context>
chip_gen: v7x
topology: tpu7x:2x2x1
jax: 0.10.0
libtpu: 0.0.40
codegen_flags: <defaults>
</compile_context>

<pallas_src>
import jax
import jax.numpy as jnp
from jax.experimental import pallas as pl
from jax.experimental.pallas import tpu as pltpu


def _round_up(x, m):
    return ((x + m - 1) // m) * m


def _sublane_rows(rows, dtype):
    """Rows occupied in VMEM after sublane padding (8 f32, 16 bf16, 32 int8)."""
    packing = max(1, 4 // jnp.dtype(dtype).itemsize)
    return _round_up(max(int(rows), 1), 8 * packing)


def _pick_chunk(bt, nk):
    """Lane-dense chunk width that divides nk and bounds vreg pressure."""
    ch = 512
    while ch > 128 and bt * ch > 4096:
        ch //= 2
    while ch > 128 and nk % ch != 0:
        ch //= 2
    return ch


def _svd_head_stats_kernel(src_ref, tgt_ref, w_ref, out_ref, acc_ref):
    """Accumulate the per-batch 4x4 weighted moment matrix.

    Block shapes (channel-major inputs):
      src_ref, tgt_ref : (3, bt, nk)
      w_ref            : (bt, nk)
      out_ref          : (bt, 128)      written once, at the last k step
      acc_ref          : (16, bt, 128)  f32 per-lane running sums
    Stat index 4*i + j, with a = [w*s0, w*s1, w*s2, w] and b = [t0, t1, t2, 1]:
      i<3, j<3 : G[i, j] = sum_n w * src_i * tgt_j
      i<3, j=3 : sum_n w * src_i      (torch srcm, unnormalized)
      i=3, j<3 : sum_n w * tgt_j      (torch tgtm, unnormalized)
      i=3, j=3 : sum_n w
    Grid = (n_split ["parallel"], batch blocks ["parallel"],
            N blocks ["arbitrary" reduction]).
    """
    k = pl.program_id(2)

    @pl.when(k == 0)
    def _init():
        acc_ref[...] = jnp.zeros_like(acc_ref)

    bt, nk = w_ref.shape
    chunk = _pick_chunk(bt, nk)
    nchunks = nk // chunk

    def fold_to_128(x):
        # (bt, c) -> (bt, 128): lane-tile-aligned halving adds (pure VPU,
        # no cross-lane XLU work, no relayout).
        c = x.shape[-1]
        while c > 128:
            h = c // 2
            x = x[:, :h] + x[:, h:]
            c = h
        return x

    # Group the 16 stats by their `a` factor: at most ~4 chunk-sized values
    # and 4 (bt, 128) partials live at once (bounded vreg pressure for any
    # bt); inputs are re-read from VMEM per group (vld has plenty of slack,
    # HBM traffic is unchanged).
    for i in range(4):
        part = [None, None, None, None]

        def add(j, val):
            part[j] = val if part[j] is None else part[j] + val

        for c in range(nchunks):
            lo = c * chunk
            w = w_ref[:, lo:lo + chunk].astype(jnp.float32)
            if i < 3:
                a_i = w * src_ref[i, :, lo:lo + chunk].astype(jnp.float32)
            else:
                a_i = w
            for j in range(3):
                t_j = tgt_ref[j, :, lo:lo + chunk].astype(jnp.float32)
                add(j, fold_to_128(a_i * t_j))
            add(3, fold_to_128(a_i))

        for j in range(4):
            acc_ref[4 * i + j] += part[j]

    @pl.when(k == pl.num_programs(2) - 1)
    def _finalize():
        cols = [jnp.sum(acc_ref[s], axis=-1, keepdims=True) for s in range(16)]
        packed = jnp.concatenate(cols, axis=-1)                      # (bt, 16)
        out_ref[...] = jnp.concatenate(
            [packed, jnp.zeros((bt, 128 - 16), jnp.float32)], axis=-1)


def svd_head_stats(src, tgt, weights, *, block_b=16, block_n=8192):
    """Pallas hot path: returns H (B,3,3), srcm (B,1,3), tgtm (B,1,3).

    src, tgt: (B, 3, N); weights: (B, N).  Any float dtype (upcast in-kernel);
    all accumulation is f32.
    """
    B, C, N = src.shape
    assert C == 3
    assert tgt.shape == (B, 3, N) and weights.shape == (B, N)

    # --- batch tile --------------------------------------------------------
    if B <= block_b:
        bt, b_pad = B, B                       # full-dim block: no batch padding
    else:
        base = max(8, min(32, (block_b // 8) * 8))
        bt, b_pad = 8, _round_up(B, 8)
        for cand in range(8, base + 1, 8):     # minimize padded batches
            pad = _round_up(B, cand)
            if pad < b_pad or (pad == b_pad and cand > bt):
                bt, b_pad = cand, pad
    b_blocks = b_pad // bt

    # --- N tile ------------------------------------------------------------
    n_pad = _round_up(N, 128)
    nk = max(128, min(_round_up(block_n, 128), n_pad))

    # VMEM sizing: account for sublane padding; shrink nk so double-buffered
    # input blocks stay under ~75% of physical VMEM (v5e/v6e 128 MiB, v7x 64).
    try:
        phys_vmem = int(pltpu.get_tpu_info().vmem_capacity_bytes)
    except Exception:
        phys_vmem = 64 * 1024 * 1024
    hard_cap = int(phys_vmem * 0.75)

    s_isz = jnp.dtype(src.dtype).itemsize
    t_isz = jnp.dtype(tgt.dtype).itemsize
    w_isz = jnp.dtype(weights.dtype).itemsize
    fixed_bytes = (16 + 2) * _round_up(bt, 8) * 128 * 4 + (1 << 20)

    def vmem_need(nk_):
        blk = (3 * _sublane_rows(bt, src.dtype) * nk_ * s_isz
               + 3 * _sublane_rows(bt, tgt.dtype) * nk_ * t_isz
               + _sublane_rows(bt, weights.dtype) * nk_ * w_isz)
        return 2 * blk + fixed_bytes           # double-buffered input blocks

    while nk > 128 and vmem_need(nk) > hard_cap:
        nk = max(128, (nk // 2 // 128) * 128)

    kb_total = pl.cdiv(n_pad, nk)

    # v7x: if the batch axis has a single block, split the N reduction across
    # a leading size-2 "parallel" axis so both TensorCores get work.
    n_split = 2 if (b_blocks == 1 and kb_total >= 2) else 1
    kb = pl.cdiv(kb_total, n_split)
    n_pad = n_split * kb * nk

    # --- channel-major layout + zero padding (exact: padded weights are 0,
    # padded batches are sliced off before the SVD) -------------------------
    src_cm = jnp.transpose(src, (1, 0, 2))     # (3, B, N)
    tgt_cm = jnp.transpose(tgt, (1, 0, 2))
    if (b_pad, n_pad) != (B, N):
        src_cm = jnp.pad(src_cm, ((0, 0), (0, b_pad - B), (0, n_pad - N)))
        tgt_cm = jnp.pad(tgt_cm, ((0, 0), (0, b_pad - B), (0, n_pad - N)))
        weights = jnp.pad(weights, ((0, b_pad - B), (0, n_pad - N)))

    grid = (n_split, b_blocks, kb)
    cp_kwargs = dict(dimension_semantics=("parallel", "parallel", "arbitrary"))
    need = vmem_need(nk)
    if need > 12 * 1024 * 1024:
        cp_kwargs["vmem_limit_bytes"] = int(min(max(need, 16 << 20), hard_cap))

    slab = pl.pallas_call(
        _svd_head_stats_kernel,
        out_shape=jax.ShapeDtypeStruct((n_split, b_pad, 128), jnp.float32),
        grid=grid,
        in_specs=[
            pl.BlockSpec((3, bt, nk), lambda p, b, k: (0, b, p * kb + k)),
            pl.BlockSpec((3, bt, nk), lambda p, b, k: (0, b, p * kb + k)),
            pl.BlockSpec((bt, nk), lambda p, b, k: (b, p * kb + k)),
        ],
        out_specs=pl.BlockSpec((None, bt, 128), lambda p, b, k: (p, b, 0)),
        scratch_shapes=[pltpu.VMEM((16, bt, 128), jnp.float32)],
        compiler_params=pltpu.CompilerParams(**cp_kwargs),
    )(src_cm, tgt_cm, weights)

    slab = slab.sum(axis=0)[:B]                # combine the parallel N halves
    M = slab[:, :16].reshape(B, 4, 4)
    G = M[:, :3, :3]
    ms = M[:, :3, 3]                           # sum_n w*src  (torch srcm)
    mt = M[:, 3, :3]                           # sum_n w*tgt  (torch tgtm)
    sw = M[:, 3, 3]                            # sum_n w

    # H = sum_n w (src - srcm)(tgt - tgtm)^T = G - (2 - sum w) srcm tgtm^T.
    # TODO(synk): the uncentered-moment expansion can cancel for point clouds
    # very far from the origin; accumulation is f32 (switch to per-tile
    # centering / Kahan if inputs carry very large translations).
    H = G - (2.0 - sw)[:, None, None] * (ms[:, :, None] * mt[:, None, :])
    return H, ms[:, None, :], mt[:, None, :]


def svd_head_forward(src, tgt, weights, reflect, *, block_b=16, block_n=8192):
    """Full SVDHead.forward: returns (R (B,3,3), t (B,3))."""
    B = src.shape[0]
    H, srcm, tgtm = svd_head_stats(src, tgt, weights,
                                   block_b=block_b, block_n=block_n)

    # TODO(synk): the batched 3x3 SVD / det / reflection fix-up has no Pallas
    # TPU primitive; it runs in plain JAX (XLA) on the tiny (B, 3, 3) tensors.
    U, _, Vh = jnp.linalg.svd(H)
    V = jnp.swapaxes(Vh, -1, -2)               # torch.svd's V: H = U diag(S) V^T
    Ut = jnp.swapaxes(U, -1, -2)
    R0 = jnp.matmul(V, Ut)
    det = jnp.linalg.det(R0)
    V_fixed = jnp.where(det[:, None, None] < 0.0, jnp.matmul(V, reflect), V)
    R = jnp.matmul(V_fixed, Ut)
    t = jnp.matmul(-R, jnp.swapaxes(srcm, 1, 2)) + jnp.swapaxes(tgtm, 1, 2)
    return R, t.reshape(B, 3)


def _reference_forward(src, tgt, weights, reflect):
    """Pure-jnp reference (mirrors the PyTorch code literally) for validation."""
    B, _, N = src.shape
    w = weights[:, :, None]                           # (B, N, 1)
    src_t = jnp.swapaxes(src, 1, 2)                   # (B, N, 3)
    tgt_t = jnp.swapaxes(tgt, 1, 2)
    srcm = jnp.matmul(jnp.swapaxes(w, 1, 2), src_t)   # (B, 1, 3)
    tgtm = jnp.matmul(jnp.swapaxes(w, 1, 2), tgt_t)
    src_c = jnp.swapaxes(src_t - srcm, 1, 2)          # (B, 3, N)
    tgt_c = jnp.swapaxes(tgt_t - tgtm, 1, 2)
    Wm = jax.vmap(jnp.diag)(weights)                  # (B, N, N)
    H = jnp.matmul(src_c, jnp.matmul(Wm, jnp.swapaxes(tgt_c, 1, 2)))
    U, _, Vh = jnp.linalg.svd(H)
    V = jnp.swapaxes(Vh, -1, -2)
    Ut = jnp.swapaxes(U, -1, -2)
    R0 = jnp.matmul(V, Ut)
    det = jnp.linalg.det(R0)
    V_fixed = jnp.where(det[:, None, None] < 0.0, jnp.matmul(V, reflect), V)
    R = jnp.matmul(V_fixed, Ut)
    t = jnp.matmul(-R, jnp.swapaxes(srcm, 1, 2)) + jnp.swapaxes(tgtm, 1, 2)
    return R, t.reshape(B, 3)


if __name__ == "__main__":
    # deterministic "parameter" from __init__: reflect = eye(3) with [2,2] = -1
    reflect = jnp.eye(3, dtype=jnp.float32).at[2, 2].set(-1.0)
    key = jax.random.PRNGKey(0)

    # (B, N, dtype, weight_scale, src_offset, tgt_offset, block_b, block_n)
    configs = [
        # single batch block, single N block, default tile sizes
        (2, 256, jnp.float32, 1.0, 0.0, 0.0, 16, 8192),
        # batch padding (10 -> 2 blocks of 8), 3-step N reduction, sum(w) != 1,
        # translated clouds (exercises the uncentered-moment identity)
        (10, 300, jnp.float32, 1.7, 3.0, -2.0, 8, 128),
        # bf16 streaming, single batch block -> size-2 parallel N split (v7x),
        # N padded 640 -> 1024 with zero weights
        (3, 640, jnp.bfloat16, 1.0, 0.0, 0.0, 8, 256),
    ]
    for (B, N, dt, wscale, soff, toff, bb, bn) in configs:
        key, k1, k2, k3 = jax.random.split(key, 4)
        src = (jax.random.normal(k1, (B, 3, N), dtype=jnp.float32) + soff).astype(dt)
        tgt = (jax.random.normal(k2, (B, 3, N), dtype=jnp.float32) + toff).astype(dt)
        weights = (wscale * jax.nn.softmax(
            jax.random.normal(k3, (B, N), dtype=jnp.float32), axis=1)).astype(dt)

        R, t = svd_head_forward(src, tgt, weights, reflect,
                                block_b=bb, block_n=bn)
        jax.block_until_ready((R, t))

        R_ref, t_ref = _reference_forward(src.astype(jnp.float32),
                                          tgt.astype(jnp.float32),
                                          weights.astype(jnp.float32), reflect)
        jax.block_until_ready((R_ref, t_ref))

        assert R.shape == (B, 3, 3) and t.shape == (B, 3)
        assert jnp.allclose(R, R_ref, atol=2e-3, rtol=2e-3), (B, N, str(dt))
        assert jnp.allclose(t, t_ref, atol=2e-3, rtol=2e-3), (B, N, str(dt))

    print("KERNEL_OK")
</pallas_src>

<mosaic_0001>
module attributes {stable_mosaic.version = 11 : i64} {
  func.func @_svd_head_stats_kernel(%arg0: i32, %arg1: i32, %arg2: i32, %arg3: memref<3x2x256xf32, #tpu.memory_space<vmem>>, %arg4: memref<3x2x256xf32, #tpu.memory_space<vmem>>, %arg5: memref<2x256xf32, #tpu.memory_space<vmem>>, %arg6: memref<1x2x128xf32, #tpu.memory_space<vmem>>, %arg7: memref<16x2x128xf32, #tpu.memory_space<vmem>>) attributes {dimension_semantics = [#tpu.dimension_semantics<parallel>, #tpu.dimension_semantics<parallel>, #tpu.dimension_semantics<arbitrary>], iteration_bounds = array<i64: 1, 1, 1>, scalar_prefetch = 0 : i64, scratch_operands = 1 : i64, tpu.core_type = #tpu.core_type<tc>, window_params = [{transform_indices = @transform_0, window_bounds = array<i64: 3, 2, 256>}, {transform_indices = @transform_1, window_bounds = array<i64: 3, 2, 256>}, {transform_indices = @transform_2, window_bounds = array<i64: 2, 256>}, {transform_indices = @transform_3, window_bounds = array<i64: 1, 2, 128>}]} {
    %c0_i32 = arith.constant 0 : i32
    %0 = arith.cmpi eq, %arg2, %c0_i32 : i32
    %1 = arith.extui %0 : i1 to i32
    %c0_i32_0 = arith.constant 0 : i32
    %2 = arith.cmpi ne, %1, %c0_i32_0 : i32
    scf.if %2 {
      %cst = arith.constant 0.000000e+00 : f32
      %199 = vector.broadcast %cst : f32 to vector<16x2x128xf32>
      %c0_136 = arith.constant 0 : index
      %c0_137 = arith.constant 0 : index
      %c0_138 = arith.constant 0 : index
      %200 = vector.load %arg7[%c0_136, %c0_137, %c0_138] : memref<16x2x128xf32, #tpu.memory_space<vmem>>, vector<16x2x128xf32>
      tpu.vector_store %arg7[%c0_136, %c0_137, %c0_138], %199 {strides = array<i32>} : memref<16x2x128xf32, #tpu.memory_space<vmem>>, vector<16x2x128xf32>,
    } else {
    }
    %c0 = arith.constant 0 : index
    %c0_1 = arith.constant 0 : index
    %3 = vector.load %arg5[%c0, %c0_1] : memref<2x256xf32, #tpu.memory_space<vmem>>, vector<2x256xf32>
    %c0_2 = arith.constant 0 : index
    %c0_3 = arith.constant 0 : index
    %c0_4 = arith.constant 0 : index
    %4 = vector.load %arg3[%c0_2, %c0_3, %c0_4] : memref<3x2x256xf32, #tpu.memory_space<vmem>>, vector<1x2x256xf32>
    %5 = vector.shape_cast %4 : vector<1x2x256xf32> to vector<2x256xf32>
    %6 = arith.mulf %3, %5 : vector<2x256xf32>
    %c0_5 = arith.constant 0 : index
    %c0_6 = arith.constant 0 : index
    %c0_7 = arith.constant 0 : index
    %7 = vector.load %arg4[%c0_5, %c0_6, %c0_7] : memref<3x2x256xf32, #tpu.memory_space<vmem>>, vector<1x2x256xf32>
    %8 = vector.shape_cast %7 : vector<1x2x256xf32> to vector<2x256xf32>
    %9 = arith.mulf %6, %8 : vector<2x256xf32>
    %10 = vector.extract_strided_slice %9 {offsets = [0, 0], sizes = [2, 128], strides = [1, 1]} : vector<2x256xf32> to vector<2x128xf32>
    %11 = vector.extract_strided_slice %9 {offsets = [0, 128], sizes = [2, 128], strides = [1, 1]} : vector<2x256xf32> to vector<2x128xf32>
    %12 = arith.addf %10, %11 : vector<2x128xf32>
    %c1 = arith.constant 1 : index
    %c0_8 = arith.constant 0 : index
    %c0_9 = arith.constant 0 : index
    %13 = vector.load %arg4[%c1, %c0_8, %c0_9] : memref<3x2x256xf32, #tpu.memory_space<vmem>>, vector<1x2x256xf32>
    %14 = vector.shape_cast %13 : vector<1x2x256xf32> to vector<2x256xf32>
    %15 = arith.mulf %6, %14 : vector<2x256xf32>
    %16 = vector.extract_strided_slice %15 {offsets = [0, 0], sizes = [2, 128], strides = [1, 1]} : vector<2x256xf32> to vector<2x128xf32>
    %17 = vector.extract_strided_slice %15 {offsets = [0, 128], sizes = [2, 128], strides = [1, 1]} : vector<2x256xf32> to vector<2x128xf32>
    %18 = arith.addf %16, %17 : vector<2x128xf32>
    %c2 = arith.constant 2 : index
    %c0_10 = arith.constant 0 : index
    %c0_11 = arith.constant 0 : index
    %19 = vector.load %arg4[%c2, %c0_10, %c0_11] : memref<3x2x256xf32, #tpu.memory_space<vmem>>, vector<1x2x256xf32>
    %20 = vector.shape_cast %19 : vector<1x2x256xf32> to vector<2x256xf32>
    %21 = arith.mulf %6, %20 : vector<2x256xf32>
    %22 = vector.extract_strided_slice %21 {offsets = [0, 0], sizes = [2, 128], strides = [1, 1]} : vector<2x256xf32> to vector<2x128xf32>
    %23 = vector.extract_strided_slice %21 {offsets = [0, 128], sizes = [2, 128], strides = [1, 1]} : vector<2x256xf32> to vector<2x128xf32>
    %24 = arith.addf %22, %23 : vector<2x128xf32>
    %25 = vector.extract_strided_slice %6 {offsets = [0, 0], sizes = [2, 128], strides = [1, 1]} : vector<2x256xf32> to vector<2x128xf32>
    %26 = vector.extract_strided_slice %6 {offsets = [0, 128], sizes = [2, 128], strides = [1, 1]} : vector<2x256xf32> to vector<2x128xf32>
    %27 = arith.addf %25, %26 : vector<2x128xf32>
    %c0_12 = arith.constant 0 : index
    %c0_13 = arith.constant 0 : index
    %c0_14 = arith.constant 0 : index
    %28 = vector.load %arg7[%c0_12, %c0_13, %c0_14] : memref<16x2x128xf32, #tpu.memory_space<vmem>>, vector<1x2x128xf32>
    %29 = vector.shape_cast %28 : vector<1x2x128xf32> to vector<2x128xf32>
    %30 = arith.addf %29, %12 : vector<2x128xf32>
    %c0_15 = arith.constant 0 : index
    %c0_16 = arith.constant 0 : index
    %c0_17 = arith.constant 0 : index
    %31 = vector.load %arg7[%c0_15, %c0_16, %c0_17] : memref<16x2x128xf32, #tpu.memory_space<vmem>>, vector<1x2x128xf32>
    %32 = vector.shape_cast %31 : vector<1x2x128xf32> to vector<2x128xf32>
    %33 = vector.shape_cast %30 : vector<2x128xf32> to vector<1x2x128xf32>
    tpu.vector_store %arg7[%c0_15, %c0_16, %c0_17], %33 {strides = array<i32>} : memref<16x2x128xf32, #tpu.memory_space<vmem>>, vector<1x2x128xf32>,
    %c1_18 = arith.constant 1 : index
    %c0_19 = arith.constant 0 : index
    %c0_20 = arith.constant 0 : index
    %34 = vector.load %arg7[%c1_18, %c0_19, %c0_20] : memref<16x2x128xf32, #tpu.memory_space<vmem>>, vector<1x2x128xf32>
    %35 = vector.shape_cast %34 : vector<1x2x128xf32> to vector<2x128xf32>
    %36 = arith.addf %35, %18 : vector<2x128xf32>
    %c1_21 = arith.constant 1 : index
    %c0_22 = arith.constant 0 : index
    %c0_23 = arith.constant 0 : index
    %37 = vector.load %arg7[%c1_21, %c0_22, %c0_23] : memref<16x2x128xf32, #tpu.memory_space<vmem>>, vector<1x2x128xf32>
    %38 = vector.shape_cast %37 : vector<1x2x128xf32> to vector<2x128xf32>
    %39 = vector.shape_cast %36 : vector<2x128xf32> to vector<1x2x128xf32>
    tpu.vector_store %arg7[%c1_21, %c0_22, %c0_23], %39 {strides = array<i32>} : memref<16x2x128xf32, #tpu.memory_space<vmem>>, vector<1x2x128xf32>,
    %c2_24 = arith.constant 2 : index
    %c0_25 = arith.constant 0 : index
    %c0_26 = arith.constant 0 : index
    %40 = vector.load %arg7[%c2_24, %c0_25, %c0_26] : memref<16x2x128xf32, #tpu.memory_space<vmem>>, vector<1x2x128xf32>
    %41 = vector.shape_cast %40 : vector<1x2x128xf32> to vector<2x128xf32>
    %42 = arith.addf %41, %24 : vector<2x128xf32>
    %c2_27 = arith.constant 2 : index
    %c0_28 = arith.constant 0 : index
    %c0_29 = arith.constant 0 : index
    %43 = vector.load %arg7[%c2_27, %c0_28, %c0_29] : memref<16x2x128xf32, #tpu.memory_space<vmem>>, vector<1x2x128xf32>
    %44 = vector.shape_cast %43 : vector<1x2x128xf32> to vector<2x128xf32>
    %45 = vector.shape_cast %42 : vector<2x128xf32> to vector<1x2x128xf32>
    tpu.vector_store %arg7[%c2_27, %c0_28, %c0_29], %45 {strides = array<i32>} : memref<16x2x128xf32, #tpu.memory_space<vmem>>, vector<1x2x128xf32>,
    %c3 = arith.constant 3 : index
    %c0_30 = arith.constant 0 : index
    %c0_31 = arith.constant 0 : index
    %46 = vector.load %arg7[%c3, %c0_30, %c0_31] : memref<16x2x128xf32, #tpu.memory_space<vmem>>, vector<1x2x128xf32>
    %47 = vector.shape_cast %46 : vector<1x2x128xf32> to vector<2x128xf32>
    %48 = arith.addf %47, %27 : vector<2x128xf32>
    %c3_32 = arith.constant 3 : index
    %c0_33 = arith.constant 0 : index
    %c0_34 = arith.constant 0 : index
    %49 = vector.load %arg7[%c3_32, %c0_33, %c0_34] : memref<16x2x128xf32, #tpu.memory_space<vmem>>, vector<1x2x128xf32>
    %50 = vector.shape_cast %49 : vector<1x2x128xf32> to vector<2x128xf32>
    %51 = vector.shape_cast %48 : vector<2x128xf32> to vector<1x2x128xf32>
    tpu.vector_store %arg7[%c3_32, %c0_33, %c0_34], %51 {strides = array<i32>} : memref<16x2x128xf32, #tpu.memory_space<vmem>>, vector<1x2x128xf32>,
    %c0_35 = arith.constant 0 : index
    %c0_36 = arith.constant 0 : index
    %52 = vector.load %arg5[%c0_35, %c0_36] : memref<2x256xf32, #tpu.memory_space<vmem>>, vector<2x256xf32>
    %c1_37 = arith.constant 1 : index
    %c0_38 = arith.constant 0 : index
    %c0_39 = arith.constant 0 : index
    %53 = vector.load %arg3[%c1_37, %c0_38, %c0_39] : memref<3x2x256xf32, #tpu.memory_space<vmem>>, vector<1x2x256xf32>
    %54 = vector.shape_cast %53 : vector<1x2x256xf32> to vector<2x256xf32>
    %55 = arith.mulf %52, %54 : vector<2x256xf32>
    %c0_40 = arith.constant 0 : index
    %c0_41 = arith.constant 0 : index
    %c0_42 = arith.constant 0 : index
    %56 = vector.load %arg4[%c0_40, %c0_41, %c0_42] : memref<3x2x256xf32, #tpu.memory_space<vmem>>, vector<1x2x256xf32>
    %57 = vector.shape_cast %56 : vector<1x2x256xf32> to vector<2x256xf32>
    %58 = arith.mulf %55, %57 : vector<2x256xf32>
    %59 = vector.extract_strided_slice %58 {offsets = [0, 0], sizes = [2, 128], strides = [1, 1]} : vector<2x256xf32> to vector<2x128xf32>
    %60 = vector.extract_strided_slice %58 {offsets = [0, 128], sizes = [2, 128], strides = [1, 1]} : vector<2x256xf32> to vector<2x128xf32>
    %61 = arith.addf %59, %60 : vector<2x128xf32>
    %c1_43 = arith.constant 1 : index
    %c0_44 = arith.constant 0 : index
    %c0_45 = arith.constant 0 : index
    %62 = vector.load %arg4[%c1_43, %c0_44, %c0_45] : memref<3x2x256xf32, #tpu.memory_space<vmem>>, vector<1x2x256xf32>
    %63 = vector.shape_cast %62 : vector<1x2x256xf32> to vector<2x256xf32>
    %64 = arith.mulf %55, %63 : vector<2x256xf32>
    %65 = vector.extract_strided_slice %64 {offsets = [0, 0], sizes = [2, 128], strides = [1, 1]} : vector<2x256xf32> to vector<2x128xf32>
    %66 = vector.extract_strided_slice %64 {offsets = [0, 128], sizes = [2, 128], strides = [1, 1]} : vector<2x256xf32> to vector<2x128xf32>
    %67 = arith.addf %65, %66 : vector<2x128xf32>
    %c2_46 = arith.constant 2 : index
    %c0_47 = arith.constant 0 : index
    %c0_48 = arith.constant 0 : index
    %68 = vector.load %arg4[%c2_46, %c0_47, %c0_48] : memref<3x2x256xf32, #tpu.memory_space<vmem>>, vector<1x2x256xf32>
    %69 = vector.shape_cast %68 : vector<1x2x256xf32> to vector<2x256xf32>
    %70 = arith.mulf %55, %69 : vector<2x256xf32>
    %71 = vector.extract_strided_slice %70 {offsets = [0, 0], sizes = [2, 128], strides = [1, 1]} : vector<2x256xf32> to vector<2x128xf32>
    %72 = vector.extract_strided_slice %70 {offsets = [0, 128], sizes = [2, 128], strides = [1, 1]} : vector<2x256xf32> to vector<2x128xf32>
    %73 = arith.addf %71, %72 : vector<2x128xf32>
    %74 = vector.extract_strided_slice %55 {offsets = [0, 0], sizes = [2, 128], strides = [1, 1]} : vector<2x256xf32> to vector<2x128xf32>
    %75 = vector.extract_strided_slice %55 {offsets = [0, 128], sizes = [2, 128], strides = [1, 1]} : vector<2x256xf32> to vector<2x128xf32>
    %76 = arith.addf %74, %75 : vector<2x128xf32>
    %c4 = arith.constant 4 : index
    %c0_49 = arith.constant 0 : index
    %c0_50 = arith.constant 0 : index
    %77 = vector.load %arg7[%c4, %c0_49, %c0_50] : memref<16x2x128xf32, #tpu.memory_space<vmem>>, vector<1x2x128xf32>
    %78 = vector.shape_cast %77 : vector<1x2x128xf32> to vector<2x128xf32>
    %79 = arith.addf %78, %61 : vector<2x128xf32>
    %c4_51 = arith.constant 4 : index
    %c0_52 = arith.constant 0 : index
    %c0_53 = arith.constant 0 : index
    %80 = vector.load %arg7[%c4_51, %c0_52, %c0_53] : memref<16x2x128xf32, #tpu.memory_space<vmem>>, vector<1x2x128xf32>
    %81 = vector.shape_cast %80 : vector<1x2x128xf32> to vector<2x128xf32>
    %82 = vector.shape_cast %79 : vector<2x128xf32> to vector<1x2x128xf32>
    tpu.vector_store %arg7[%c4_51, %c0_52, %c0_53], %82 {strides = array<i32>} : memref<16x2x128xf32, #tpu.memory_space<vmem>>, vector<1x2x128xf32>,
    %c5 = arith.constant 5 : index
    %c0_54 = arith.constant 0 : index
    %c0_55 = arith.constant 0 : index
    %83 = vector.load %arg7[%c5, %c0_54, %c0_55] : memref<16x2x128xf32, #tpu.memory_space<vmem>>, vector<1x2x128xf32>
    %84 = vector.shape_cast %83 : vector<1x2x128xf32> to vector<2x128xf32>
    %85 = arith.addf %84, %67 : vector<2x128xf32>
    %c5_56 = arith.constant 5 : index
    %c0_57 = arith.constant 0 : index
    %c0_58 = arith.constant 0 : index
    %86 = vector.load %arg7[%c5_56, %c0_57, %c0_58] : memref<16x2x128xf32, #tpu.memory_space<vmem>>, vector<1x2x128xf32>
    %87 = vector.shape_cast %86 : vector<1x2x128xf32> to vector<2x128xf32>
    %88 = vector.shape_cast %85 : vector<2x128xf32> to vector<1x2x128xf32>
    tpu.vector_store %arg7[%c5_56, %c0_57, %c0_58], %88 {strides = array<i32>} : memref<16x2x128xf32, #tpu.memory_space<vmem>>, vector<1x2x128xf32>,
    %c6 = arith.constant 6 : index
    %c0_59 = arith.constant 0 : index
    %c0_60 = arith.constant 0 : index
    %89 = vector.load %arg7[%c6, %c0_59, %c0_60] : memref<16x2x128xf32, #tpu.memory_space<vmem>>, vector<1x2x128xf32>
    %90 = vector.shape_cast %89 : vector<1x2x128xf32> to vector<2x128xf32>
    %91 = arith.addf %90, %73 : vector<2x128xf32>
    %c6_61 = arith.constant 6 : index
    %c0_62 = arith.constant 0 : index
    %c0_63 = arith.constant 0 : index
    %92 = vector.load %arg7[%c6_61, %c0_62, %c0_63] : memref<16x2x128xf32, #tpu.memory_space<vmem>>, vector<1x2x128xf32>
    %93 = vector.shape_cast %92 : vector<1x2x128xf32> to vector<2x128xf32>
    %94 = vector.shape_cast %91 : vector<2x128xf32> to vector<1x2x128xf32>
    tpu.vector_store %arg7[%c6_61, %c0_62, %c0_63], %94 {strides = array<i32>} : memref<16x2x128xf32, #tpu.memory_space<vmem>>, vector<1x2x128xf32>,
    %c7 = arith.constant 7 : index
    %c0_64 = arith.constant 0 : index
    %c0_65 = arith.constant 0 : index
    %95 = vector.load %arg7[%c7, %c0_64, %c0_65] : memref<16x2x128xf32, #tpu.memory_space<vmem>>, vector<1x2x128xf32>
    %96 = vector.shape_cast %95 : vector<1x2x128xf32> to vector<2x128xf32>
    %97 = arith.addf %96, %76 : vector<2x128xf32>
    %c7_66 = arith.constant 7 : index
    %c0_67 = arith.constant 0 : index
    %c0_68 = arith.constant 0 : index
    %98 = vector.load %arg7[%c7_66, %c0_67, %c0_68] : memref<16x2x128xf32, #tpu.memory_space<vmem>>, vector<1x2x128xf32>
    %99 = vector.shape_cast %98 : vector<1x2x128xf32> to vector<2x128xf32>
    %100 = vector.shape_cast %97 : vector<2x128xf32> to vector<1x2x128xf32>
    tpu.vector_store %arg7[%c7_66, %c0_67, %c0_68], %100 {strides = array<i32>} : memref<16x2x128xf32, #tpu.memory_space<vmem>>, vector<1x2x128xf32>,
    %c0_69 = arith.constant 0 : index
    %c0_70 = arith.constant 0 : index
    %101 = vector.load %arg5[%c0_69, %c0_70] : memref<2x256xf32, #tpu.memory_space<vmem>>, vector<2x256xf32>
    %c2_71 = arith.constant 2 : index
    %c0_72 = arith.constant 0 : index
    %c0_73 = arith.constant 0 : index
    %102 = vector.load %arg3[%c2_71, %c0_72, %c0_73] : memref<3x2x256xf32, #tpu.memory_space<vmem>>, vector<1x2x256xf32>
    %103 = vector.shape_cast %102 : vector<1x2x256xf32> to vector<2x256xf32>
    %104 = arith.mulf %101, %103 : vector<2x256xf32>
    %c0_74 = arith.constant 0 : index
    %c0_75 = arith.constant 0 : index
    %c0_76 = arith.constant 0 : index
    %105 = vector.load %arg4[%c0_74, %c0_75, %c0_76] : memref<3x2x256xf32, #tpu.memory_space<vmem>>, vector<1x2x256xf32>
    %106 = vector.shape_cast %105 : vector<1x2x256xf32> to vector<2x256xf32>
    %107 = arith.mulf %104, %106 : vector<2x256xf32>
    %108 = vector.extract_strided_slice %107 {offsets = [0, 0], sizes = [2, 128], strides = [1, 1]} : vector<2x256xf32> to vector<2x128xf32>
    %109 = vector.extract_strided_slice %107 {offsets = [0, 128], sizes = [2, 128], strides = [1, 1]} : vector<2x256xf32> to vector<2x128xf32>
    %110 = arith.addf %108, %109 : vector<2x128xf32>
    %c1_77 = arith.constant 1 : index
    %c0_78 = arith.constant 0 : index
    %c0_79 = arith.constant 0 : index
    %111 = vector.load %arg4[%c1_77, %c0_78, %c0_79] : memref<3x2x256xf32, #tpu.memory_space<vmem>>, vector<1x2x256xf32>
    %112 = vector.shape_cast %111 : vector<1x2x256xf32> to vector<2x256xf32>
    %113 = arith.mulf %104, %112 : vector<2x256xf32>
    %114 = vector.extract_strided_slice %113 {offsets = [0, 0], sizes = [2, 128], strides = [1, 1]} : vector<2x256xf32> to vector<2x128xf32>
    %115 = vector.extract_strided_slice %113 {offsets = [0, 128], sizes = [2, 128], strides = [1, 1]} : vector<2x256xf32> to vector<2x128xf32>
    %116 = arith.addf %114, %115 : vector<2x128xf32>
    %c2_80 = arith.constant 2 : index
    %c0_81 = arith.constant 0 : index
    %c0_82 = arith.constant 0 : index
    %117 = vector.load %arg4[%c2_80, %c0_81, %c0_82] : memref<3x2x256xf32, #tpu.memory_space<vmem>>, vector<1x2x256xf32>
    %118 = vector.shape_cast %117 : vector<1x2x256xf32> to vector<2x256xf32>
    %119 = arith.mulf %104, %118 : vector<2x256xf32>
    %120 = vector.extract_strided_slice %119 {offsets = [0, 0], sizes = [2, 128], strides = [1, 1]} : vector<2x256xf32> to vector<2x128xf32>
    %121 = vector.extract_strided_slice %119 {offsets = [0, 128], sizes = [2, 128], strides = [1, 1]} : vector<2x256xf32> to vector<2x128xf32>
    %122 = arith.addf %120, %121 : vector<2x128xf32>
    %123 = vector.extract_strided_slice %104 {offsets = [0, 0], sizes = [2, 128], strides = [1, 1]} : vector<2x256xf32> to vector<2x128xf32>
    %124 = vector.extract_strided_slice %104 {offsets = [0, 128], sizes = [2, 128], strides = [1, 1]} : vector<2x256xf32> to vector<2x128xf32>
    %125 = arith.addf %123, %124 : vector<2x128xf32>
    %c8 = arith.constant 8 : index
    %c0_83 = arith.constant 0 : index
    %c0_84 = arith.constant 0 : index
    %126 = vector.load %arg7[%c8, %c0_83, %c0_84] : memref<16x2x128xf32, #tpu.memory_space<vmem>>, vector<1x2x128xf32>
    %127 = vector.shape_cast %126 : vector<1x2x128xf32> to vector<2x128xf32>
    %128 = arith.addf %127, %110 : vector<2x128xf32>
    %c8_85 = arith.constant 8 : index
    %c0_86 = arith.constant 0 : index
    %c0_87 = arith.constant 0 : index
    %129 = vector.load %arg7[%c8_85, %c0_86, %c0_87] : memref<16x2x128xf32, #tpu.memory_space<vmem>>, vector<1x2x128xf32>
    %130 = vector.shape_cast %129 : vector<1x2x128xf32> to vector<2x128xf32>
    %131 = vector.shape_cast %128 : vector<2x128xf32> to vector<1x2x128xf32>
    tpu.vector_store %arg7[%c8_85, %c0_86, %c0_87], %131 {strides = array<i32>} : memref<16x2x128xf32, #tpu.memory_space<vmem>>, vector<1x2x128xf32>,
    %c9 = arith.constant 9 : index
    %c0_88 = arith.constant 0 : index
    %c0_89 = arith.constant 0 : index
    %132 = vector.load %arg7[%c9, %c0_88, %c0_89] : memref<16x2x128xf32, #tpu.memory_space<vmem>>, vector<1x2x128xf32>
    %133 = vector.shape_cast %132 : vector<1x2x128xf32> to vector<2x128xf32>
    %134 = arith.addf %133, %116 : vector<2x128xf32>
    %c9_90 = arith.constant 9 : index
    %c0_91 = arith.constant 0 : index
    %c0_92 = arith.constant 0 : index
    %135 = vector.load %arg7[%c9_90, %c0_91, %c0_92] : memref<16x2x128xf32, #tpu.memory_space<vmem>>, vector<1x2x128xf32>
    %136 = vector.shape_cast %135 : vector<1x2x128xf32> to vector<2x128xf32>
    %137 = vector.shape_cast %134 : vector<2x128xf32> to vector<1x2x128xf32>
    tpu.vector_store %arg7[%c9_90, %c0_91, %c0_92], %137 {strides = array<i32>} : memref<16x2x128xf32, #tpu.memory_space<vmem>>, vector<1x2x128xf32>,
    %c10 = arith.constant 10 : index
    %c0_93 = arith.constant 0 : index
    %c0_94 = arith.constant 0 : index
    %138 = vector.load %arg7[%c10, %c0_93, %c0_94] : memref<16x2x128xf32, #tpu.memory_space<vmem>>, vector<1x2x128xf32>
    %139 = vector.shape_cast %138 : vector<1x2x128xf32> to vector<2x128xf32>
    %140 = arith.addf %139, %122 : vector<2x128xf32>
    %c10_95 = arith.constant 10 : index
    %c0_96 = arith.constant 0 : index
    %c0_97 = arith.constant 0 : index
    %141 = vector.load %arg7[%c10_95, %c0_96, %c0_97] : memref<16x2x128xf32, #tpu.memory_space<vmem>>, vector<1x2x128xf32>
    %142 = vector.shape_cast %141 : vector<1x2x128xf32> to vector<2x128xf32>
    %143 = vector.shape_cast %140 : vector<2x128xf32> to vector<1x2x128xf32>
    tpu.vector_store %arg7[%c10_95, %c0_96, %c0_97], %143 {strides = array<i32>} : memref<16x2x128xf32, #tpu.memory_space<vmem>>, vector<1x2x128xf32>,
    %c11 = arith.constant 11 : index
    %c0_98 = arith.constant 0 : index
    %c0_99 = arith.constant 0 : index
    %144 = vector.load %arg7[%c11, %c0_98, %c0_99] : memref<16x2x128xf32, #tpu.memory_space<vmem>>, vector<1x2x128xf32>
    %145 = vector.shape_cast %144 : vector<1x2x128xf32> to vector<2x128xf32>
    %146 = arith.addf %145, %125 : vector<2x128xf32>
    %c11_100 = arith.constant 11 : index
    %c0_101 = arith.constant 0 : index
    %c0_102 = arith.constant 0 : index
    %147 = vector.load %arg7[%c11_100, %c0_101, %c0_102] : memref<16x2x128xf32, #tpu.memory_space<vmem>>, vector<1x2x128xf32>
    %148 = vector.shape_cast %147 : vector<1x2x128xf32> to vector<2x128xf32>
    %149 = vector.shape_cast %146 : vector<2x128xf32> to vector<1x2x128xf32>
    tpu.vector_store %arg7[%c11_100, %c0_101, %c0_102], %149 {strides = array<i32>} : memref<16x2x128xf32, #tpu.memory_space<vmem>>, vector<1x2x128xf32>,
    %c0_103 = arith.constant 0 : index
    %c0_104 = arith.constant 0 : index
    %150 = vector.load %arg5[%c0_103, %c0_104] : memref<2x256xf32, #tpu.memory_space<vmem>>, vector<2x256xf32>
    %c0_105 = arith.constant 0 : index
    %c0_106 = arith.constant 0 : index
    %c0_107 = arith.constant 0 : index
    %151 = vector.load %arg4[%c0_105, %c0_106, %c0_107] : memref<3x2x256xf32, #tpu.memory_space<vmem>>, vector<1x2x256xf32>
    %152 = vector.shape_cast %151 : vector<1x2x256xf32> to vector<2x256xf32>
    %153 = arith.mulf %150, %152 : vector<2x256xf32>
    %154 = vector.extract_strided_slice %153 {offsets = [0, 0], sizes = [2, 128], strides = [1, 1]} : vector<2x256xf32> to vector<2x128xf32>
    %155 = vector.extract_strided_slice %153 {offsets = [0, 128], sizes = [2, 128], strides = [1, 1]} : vector<2x256xf32> to vector<2x128xf32>
    %156 = arith.addf %154, %155 : vector<2x128xf32>
    %c1_108 = arith.constant 1 : index
    %c0_109 = arith.constant 0 : index
    %c0_110 = arith.constant 0 : index
    %157 = vector.load %arg4[%c1_108, %c0_109, %c0_110] : memref<3x2x256xf32, #tpu.memory_space<vmem>>, vector<1x2x256xf32>
    %158 = vector.shape_cast %157 : vector<1x2x256xf32> to vector<2x256xf32>
    %159 = arith.mulf %150, %158 : vector<2x256xf32>
    %160 = vector.extract_strided_slice %159 {offsets = [0, 0], sizes = [2, 128], strides = [1, 1]} : vector<2x256xf32> to vector<2x128xf32>
    %161 = vector.extract_strided_slice %159 {offsets = [0, 128], sizes = [2, 128], strides = [1, 1]} : vector<2x256xf32> to vector<2x128xf32>
    %162 = arith.addf %160, %161 : vector<2x128xf32>
    %c2_111 = arith.constant 2 : index
    %c0_112 = arith.constant 0 : index
    %c0_113 = arith.constant 0 : index
    %163 = vector.load %arg4[%c2_111, %c0_112, %c0_113] : memref<3x2x256xf32, #tpu.memory_space<vmem>>, vector<1x2x256xf32>
    %164 = vector.shape_cast %163 : vector<1x2x256xf32> to vector<2x256xf32>
    %165 = arith.mulf %150, %164 : vector<2x256xf32>
    %166 = vector.extract_strided_slice %165 {offsets = [0, 0], sizes = [2, 128], strides = [1, 1]} : vector<2x256xf32> to vector<2x128xf32>
    %167 = vector.extract_strided_slice %165 {offsets = [0, 128], sizes = [2, 128], strides = [1, 1]} : vector<2x256xf32> to vector<2x128xf32>
    %168 = arith.addf %166, %167 : vector<2x128xf32>
    %169 = vector.extract_strided_slice %150 {offsets = [0, 0], sizes = [2, 128], strides = [1, 1]} : vector<2x256xf32> to vector<2x128xf32>
    %170 = vector.extract_strided_slice %150 {offsets = [0, 128], sizes = [2, 128], strides = [1, 1]} : vector<2x256xf32> to vector<2x128xf32>
    %171 = arith.addf %169, %170 : vector<2x128xf32>
    %c12 = arith.constant 12 : index
    %c0_114 = arith.constant 0 : index
    %c0_115 = arith.constant 0 : index
    %172 = vector.load %arg7[%c12, %c0_114, %c0_115] : memref<16x2x128xf32, #tpu.memory_space<vmem>>, vector<1x2x128xf32>
    %173 = vector.shape_cast %172 : vector<1x2x128xf32> to vector<2x128xf32>
    %174 = arith.addf %173, %156 : vector<2x128xf32>
    %c12_116 = arith.constant 12 : index
    %c0_117 = arith.constant 0 : index
    %c0_118 = arith.constant 0 : index
    %175 = vector.load %arg7[%c12_116, %c0_117, %c0_118] : memref<16x2x128xf32, #tpu.memory_space<vmem>>, vector<1x2x128xf32>
    %176 = vector.shape_cast %175 : vector<1x2x128xf32> to vector<2x128xf32>
    %177 = vector.shape_cast %174 : vector<2x128xf32> to vector<1x2x128xf32>
    tpu.vector_store %arg7[%c12_116, %c0_117, %c0_118], %177 {strides = array<i32>} : memref<16x2x128xf32, #tpu.memory_space<vmem>>, vector<1x2x128xf32>,
    %c13 = arith.constant 13 : index
    %c0_119 = arith.constant 0 : index
    %c0_120 = arith.constant 0 : index
    %178 = vector.load %arg7[%c13, %c0_119, %c0_120] : memref<16x2x128xf32, #tpu.memory_space<vmem>>, vector<1x2x128xf32>
    %179 = vector.shape_cast %178 : vector<1x2x128xf32> to vector<2x128xf32>
    %180 = arith.addf %179, %162 : vector<2x128xf32>
    %c13_121 = arith.constant 13 : index
    %c0_122 = arith.constant 0 : index
    %c0_123 = arith.constant 0 : index
    %181 = vector.load %arg7[%c13_121, %c0_122, %c0_123] : memref<16x2x128xf32, #tpu.memory_space<vmem>>, vector<1x2x128xf32>
    %182 = vector.shape_cast %181 : vector<1x2x128xf32> to vector<2x128xf32>
    %183 = vector.shape_cast %180 : vector<2x128xf32> to vector<1x2x128xf32>
    tpu.vector_store %arg7[%c13_121, %c0_122, %c0_123], %183 {strides = array<i32>} : memref<16x2x128xf32, #tpu.memory_space<vmem>>, vector<1x2x128xf32>,
    %c14 = arith.constant 14 : index
    %c0_124 = arith.constant 0 : index
    %c0_125 = arith.constant 0 : index
    %184 = vector.load %arg7[%c14, %c0_124, %c0_125] : memref<16x2x128xf32, #tpu.memory_space<vmem>>, vector<1x2x128xf32>
    %185 = vector.shape_cast %184 : vector<1x2x128xf32> to vector<2x128xf32>
    %186 = arith.addf %185, %168 : vector<2x128xf32>
    %c14_126 = arith.constant 14 : index
    %c0_127 = arith.constant 0 : index
    %c0_128 = arith.constant 0 : index
    %187 = vector.load %arg7[%c14_126, %c0_127, %c0_128] : memref<16x2x128xf32, #tpu.memory_space<vmem>>, vector<1x2x128xf32>
    %188 = vector.shape_cast %187 : vector<1x2x128xf32> to vector<2x128xf32>
    %189 = vector.shape_cast %186 : vector<2x128xf32> to vector<1x2x128xf32>
    tpu.vector_store %arg7[%c14_126, %c0_127, %c0_128], %189 {strides = array<i32>} : memref<16x2x128xf32, #tpu.memory_space<vmem>>, vector<1x2x128xf32>,
    %c15 = arith.constant 15 : index
    %c0_129 = arith.constant 0 : index
    %c0_130 = arith.constant 0 : index
    %190 = vector.load %arg7[%c15, %c0_129, %c0_130] : memref<16x2x128xf32, #tpu.memory_space<vmem>>, vector<1x2x128xf32>
    %191 = vector.shape_cast %190 : vector<1x2x128xf32> to vector<2x128xf32>
    %192 = arith.addf %191, %171 : vector<2x128xf32>
    %c15_131 = arith.constant 15 : index
    %c0_132 = arith.constant 0 : index
    %c0_133 = arith.constant 0 : index
    %193 = vector.load %arg7[%c15_131, %c0_132, %c0_133] : memref<16x2x128xf32, #tpu.memory_space<vmem>>, vector<1x2x128xf32>
    %194 = vector.shape_cast %193 : vector<1x2x128xf32> to vector<2x128xf32>
    %195 = vector.shape_cast %192 : vector<2x128xf32> to vector<1x2x128xf32>
    tpu.vector_store %arg7[%c15_131, %c0_132, %c0_133], %195 {strides = array<i32>} : memref<16x2x128xf32, #tpu.memory_space<vmem>>, vector<1x2x128xf32>,
    %c0_i32_134 = arith.constant 0 : i32
    %196 = arith.cmpi eq, %arg2, %c0_i32_134 : i32
    %197 = arith.extui %196 : i1 to i32
    %c0_i32_135 = arith.constant 0 : i32
    %198 = arith.cmpi ne, %197, %c0_i32_135 : i32
    scf.if %198 {
      %c0_136 = arith.constant 0 : index
      %c0_137 = arith.constant 0 : index
      %c0_138 = arith.constant 0 : index
      %199 = vector.load %arg7[%c0_136, %c0_137, %c0_138] : memref<16x2x128xf32, #tpu.memory_space<vmem>>, vector<1x2x128xf32>
      %200 = vector.shape_cast %199 : vector<1x2x128xf32> to vector<2x128xf32>
      %cst = arith.constant dense<0.000000e+00> : vector<2xf32>
      %201 = vector.multi_reduction <add>, %200, %cst [1] : vector<2x128xf32> to vector<2xf32>
      %202 = vector.shape_cast %201 : vector<2xf32> to vector<2x1xf32>
      %c1_139 = arith.constant 1 : index
      %c0_140 = arith.constant 0 : index
      %c0_141 = arith.constant 0 : index
      %203 = vector.load %arg7[%c1_139, %c0_140, %c0_141] : memref<16x2x128xf32, #tpu.memory_space<vmem>>, vector<1x2x128xf32>
      %204 = vector.shape_cast %203 : vector<1x2x128xf32> to vector<2x128xf32>
      %cst_142 = arith.constant dense<0.000000e+00> : vector<2xf32>
      %205 = vector.multi_reduction <add>, %204, %cst_142 [1] : vector<2x128xf32> to vector<2xf32>
      %206 = vector.shape_cast %205 : vector<2xf32> to vector<2x1xf32>
      %c2_143 = arith.constant 2 : index
      %c0_144 = arith.constant 0 : index
      %c0_145 = arith.constant 0 : index
      %207 = vector.load %arg7[%c2_143, %c0_144, %c0_145] : memref<16x2x128xf32, #tpu.memory_space<vmem>>, vector<1x2x128xf32>
      %208 = vector.shape_cast %207 : vector<1x2x128xf32> to vector<2x128xf32>
      %cst_146 = arith.constant dense<0.000000e+00> : vector<2xf32>
      %209 = vector.multi_reduction <add>, %208, %cst_146 [1] : vector<2x128xf32> to vector<2xf32>
      %210 = vector.shape_cast %209 : vector<2xf32> to vector<2x1xf32>
      %c3_147 = arith.constant 3 : index
      %c0_148 = arith.constant 0 : index
      %c0_149 = arith.constant 0 : index
      %211 = vector.load %arg7[%c3_147, %c0_148, %c0_149] : memref<16x2x128xf32, #tpu.memory_space<vmem>>, vector<1x2x128xf32>
      %212 = vector.shape_cast %211 : vector<1x2x128xf32> to vector<2x128xf32>
      %cst_150 = arith.constant dense<0.000000e+00> : vector<2xf32>
      %213 = vector.multi_reduction <add>, %212, %cst_150 [1] : vector<2x128xf32> to vector<2xf32>
      %214 = vector.shape_cast %213 : vector<2xf32> to vector<2x1xf32>
      %c4_151 = arith.constant 4 : index
      %c0_152 = arith.constant 0 : index
      %c0_153 = arith.constant 0 : index
      %215 = vector.load %arg7[%c4_151, %c0_152, %c0_153] : memref<16x2x128xf32, #tpu.memory_space<vmem>>, vector<1x2x128xf32>
      %216 = vector.shape_cast %215 : vector<1x2x128xf32> to vector<2x128xf32>
      %cst_154 = arith.constant dense<0.000000e+00> : vector<2xf32>
      %217 = vector.multi_reduction <add>, %216, %cst_154 [1] : vector<2x128xf32> to vector<2xf32>
      %218 = vector.shape_cast %217 : vector<2xf32> to vector<2x1xf32>
      %c5_155 = arith.constant 5 : index
      %c0_156 = arith.constant 0 : index
      %c0_157 = arith.constant 0 : index
      %219 = vector.load %arg7[%c5_155, %c0_156, %c0_157] : memref<16x2x128xf32, #tpu.memory_space<vmem>>, vector<1x2x128xf32>
      %220 = vector.shape_cast %219 : vector<1x2x128xf32> to vector<2x128xf32>
      %cst_158 = arith.constant dense<0.000000e+00> : vector<2xf32>
      %221 = vector.multi_reduction <add>, %220, %cst_158 [1] : vector<2x128xf32> to vector<2xf32>
      %222 = vector.shape_cast %221 : vector<2xf32> to vector<2x1xf32>
      %c6_159 = arith.constant 6 : index
      %c0_160 = arith.constant 0 : index
      %c0_161 = arith.constant 0 : index
      %223 = vector.load %arg7[%c6_159, %c0_160, %c0_161] : memref<16x2x128xf32, #tpu.memory_space<vmem>>, vector<1x2x128xf32>
      %224 = vector.shape_cast %223 : vector<1x2x128xf32> to vector<2x128xf32>
      %cst_162 = arith.constant dense<0.000000e+00> : vector<2xf32>
      %225 = vector.multi_reduction <add>, %224, %cst_162 [1] : vector<2x128xf32> to vector<2xf32>
      %226 = vector.shape_cast %225 : vector<2xf32> to vector<2x1xf32>
      %c7_163 = arith.constant 7 : index
      %c0_164 = arith.constant 0 : index
      %c0_165 = arith.constant 0 : index
      %227 = vector.load %arg7[%c7_163, %c0_164, %c0_165] : memref<16x2x128xf32, #tpu.memory_space<vmem>>, vector<1x2x128xf32>
      %228 = vector.shape_cast %227 : vector<1x2x128xf32> to vector<2x128xf32>
      %cst_166 = arith.constant dense<0.000000e+00> : vector<2xf32>
      %229 = vector.multi_reduction <add>, %228, %cst_166 [1] : vector<2x128xf32> to vector<2xf32>
      %230 = vector.shape_cast %229 : vector<2xf32> to vector<2x1xf32>
      %c8_167 = arith.constant 8 : index
      %c0_168 = arith.constant 0 : index
      %c0_169 = arith.constant 0 : index
      %231 = vector.load %arg7[%c8_167, %c0_168, %c0_169] : memref<16x2x128xf32, #tpu.memory_space<vmem>>, vector<1x2x128xf32>
      %232 = vector.shape_cast %231 : vector<1x2x128xf32> to vector<2x128xf32>
      %cst_170 = arith.constant dense<0.000000e+00> : vector<2xf32>
      %233 = vector.multi_reduction <add>, %232, %cst_170 [1] : vector<2x128xf32> to vector<2xf32>
      %234 = vector.shape_cast %233 : vector<2xf32> to vector<2x1xf32>
      %c9_171 = arith.constant 9 : index
      %c0_172 = arith.constant 0 : index
      %c0_173 = arith.constant 0 : index
      %235 = vector.load %arg7[%c9_171, %c0_172, %c0_173] : memref<16x2x128xf32, #tpu.memory_space<vmem>>, vector<1x2x128xf32>
      %236 = vector.shape_cast %235 : vector<1x2x128xf32> to vector<2x128xf32>
      %cst_174 = arith.constant dense<0.000000e+00> : vector<2xf32>
      %237 = vector.multi_reduction <add>, %236, %cst_174 [1] : vector<2x128xf32> to vector<2xf32>
      %238 = vector.shape_cast %237 : vector<2xf32> to vector<2x1xf32>
      %c10_175 = arith.constant 10 : index
      %c0_176 = arith.constant 0 : index
      %c0_177 = arith.constant 0 : index
      %239 = vector.load %arg7[%c10_175, %c0_176, %c0_177] : memref<16x2x128xf32, #tpu.memory_space<vmem>>, vector<1x2x128xf32>
      %240 = vector.shape_cast %239 : vector<1x2x128xf32> to vector<2x128xf32>
      %cst_178 = arith.constant dense<0.000000e+00> : vector<2xf32>
      %241 = vector.multi_reduction <add>, %240, %cst_178 [1] : vector<2x128xf32> to vector<2xf32>
      %242 = vector.shape_cast %241 : vector<2xf32> to vector<2x1xf32>
      %c11_179 = arith.constant 11 : index
      %c0_180 = arith.constant 0 : index
      %c0_181 = arith.constant 0 : index
      %243 = vector.load %arg7[%c11_179, %c0_180, %c0_181] : memref<16x2x128xf32, #tpu.memory_space<vmem>>, vector<1x2x128xf32>
      %244 = vector.shape_cast %243 : vector<1x2x128xf32> to vector<2x128xf32>
      %cst_182 = arith.constant dense<0.000000e+00> : vector<2xf32>
      %245 = vector.multi_reduction <add>, %244, %cst_182 [1] : vector<2x128xf32> to vector<2xf32>
      %246 = vector.shape_cast %245 : vector<2xf32> to vector<2x1xf32>
      %c12_183 = arith.constant 12 : index
      %c0_184 = arith.constant 0 : index
      %c0_185 = arith.constant 0 : index
      %247 = vector.load %arg7[%c12_183, %c0_184, %c0_185] : memref<16x2x128xf32, #tpu.memory_space<vmem>>, vector<1x2x128xf32>
      %248 = vector.shape_cast %247 : vector<1x2x128xf32> to vector<2x128xf32>
      %cst_186 = arith.constant dense<0.000000e+00> : vector<2xf32>
      %249 = vector.multi_reduction <add>, %248, %cst_186 [1] : vector<2x128xf32> to vector<2xf32>
      %250 = vector.shape_cast %249 : vector<2xf32> to vector<2x1xf32>
      %c13_187 = arith.constant 13 : index
      %c0_188 = arith.constant 0 : index
      %c0_189 = arith.constant 0 : index
      %251 = vector.load %arg7[%c13_187, %c0_188, %c0_189] : memref<16x2x128xf32, #tpu.memory_space<vmem>>, vector<1x2x128xf32>
      %252 = vector.shape_cast %251 : vector<1x2x128xf32> to vector<2x128xf32>
      %cst_190 = arith.constant dense<0.000000e+00> : vector<2xf32>
      %253 = vector.multi_reduction <add>, %252, %cst_190 [1] : vector<2x128xf32> to vector<2xf32>
      %254 = vector.shape_cast %253 : vector<2xf32> to vector<2x1xf32>
      %c14_191 = arith.constant 14 : index
      %c0_192 = arith.constant 0 : index
      %c0_193 = arith.constant 0 : index
      %255 = vector.load %arg7[%c14_191, %c0_192, %c0_193] : memref<16x2x128xf32, #tpu.memory_space<vmem>>, vector<1x2x128xf32>
      %256 = vector.shape_cast %255 : vector<1x2x128xf32> to vector<2x128xf32>
      %cst_194 = arith.constant dense<0.000000e+00> : vector<2xf32>
      %257 = vector.multi_reduction <add>, %256, %cst_194 [1] : vector<2x128xf32> to vector<2xf32>
      %258 = vector.shape_cast %257 : vector<2xf32> to vector<2x1xf32>
      %c15_195 = arith.constant 15 : index
      %c0_196 = arith.constant 0 : index
      %c0_197 = arith.constant 0 : index
      %259 = vector.load %arg7[%c15_195, %c0_196, %c0_197] : memref<16x2x128xf32, #tpu.memory_space<vmem>>, vector<1x2x128xf32>
      %260 = vector.shape_cast %259 : vector<1x2x128xf32> to vector<2x128xf32>
      %cst_198 = arith.constant dense<0.000000e+00> : vector<2xf32>
      %261 = vector.multi_reduction <add>, %260, %cst_198 [1] : vector<2x128xf32> to vector<2xf32>
      %262 = vector.shape_cast %261 : vector<2xf32> to vector<2x1xf32>
      %263 = tpu.concatenate %202, %206, %210, %214, %218, %222, %226, %230, %234, %238, %242, %246, %250, %254, %258, %262 in 1 : vector<2x1xf32>, vector<2x1xf32>, vector<2x1xf32>, vector<2x1xf32>, vector<2x1xf32>, vector<2x1xf32>, vector<2x1xf32>, vector<2x1xf32>, vector<2x1xf32>, vector<2x1xf32>, vector<2x1xf32>, vector<2x1xf32>, vector<2x1xf32>, vector<2x1xf32>, vector<2x1xf32>, vector<2x1xf32> -> vector<2x16xf32>
      %cst_199 = arith.constant 0.000000e+00 : f32
      %264 = vector.broadcast %cst_199 : f32 to vector<2x112xf32>
      %265 = tpu.concatenate %263, %264 in 1 : vector<2x16xf32>, vector<2x112xf32> -> vector<2x128xf32>
      %c0_200 = arith.constant 0 : index
      %c0_201 = arith.constant 0 : index
      %c0_202 = arith.constant 0 : index
      %266 = vector.load %arg6[%c0_200, %c0_201, %c0_202] : memref<1x2x128xf32, #tpu.memory_space<vmem>>, vector<1x2x128xf32>
      %267 = vector.shape_cast %266 : vector<1x2x128xf32> to vector<2x128xf32>
      %268 = vector.shape_cast %265 : vector<2x128xf32> to vector<1x2x128xf32>
      tpu.vector_store %arg6[%c0_200, %c0_201, %c0_202], %268 {strides = array<i32>} : memref<1x2x128xf32, #tpu.memory_space<vmem>>, vector<1x2x128xf32>,
    } else {
    }
    return
  }
  func.func @transform_0(%arg0: i32, %arg1: i32, %arg2: i32) -> (i32, i32, i32) {
    %c1_i32 = arith.constant 1 : i32
    %0 = arith.muli %arg0, %c1_i32 : i32
    %1 = arith.addi %0, %arg2 : i32
    %c0_i32 = arith.constant 0 : i32
    %c0_i32_0 = arith.constant 0 : i32
    return %c0_i32, %arg1, %1 : i32, i32, i32
  }
  func.func @transform_1(%arg0: i32, %arg1: i32, %arg2: i32) -> (i32, i32, i32) {
    %c1_i32 = arith.constant 1 : i32
    %0 = arith.muli %arg0, %c1_i32 : i32
    %1 = arith.addi %0, %arg2 : i32
    %c0_i32 = arith.constant 0 : i32
    %c0_i32_0 = arith.constant 0 : i32
    return %c0_i32, %arg1, %1 : i32, i32, i32
  }
  func.func @transform_2(%arg0: i32, %arg1: i32, %arg2: i32) -> (i32, i32) {
    %c1_i32 = arith.constant 1 : i32
    %0 = arith.muli %arg0, %c1_i32 : i32
    %1 = arith.addi %0, %arg2 : i32
    %c0_i32 = arith.constant 0 : i32
    return %arg1, %1 : i32, i32
  }
  func.func @transform_3(%arg0: i32, %arg1: i32, %arg2: i32) -> (i32, i32, i32) {
    %c0_i32 = arith.constant 0 : i32
    %c0_i32_0 = arith.constant 0 : i32
    return %arg0, %arg1, %c0_i32 : i32, i32, i32
  }
}

</mosaic_0001>

<bundles_post_ra>
// kernel: tpu_custom_call.1
= control target key start
LH: loop header
LB: loop body
LE: loop exit
PB: predicated region body
PF: predicated region fallthrough
CT: control target
= control target key end

     0   :  { %8 = vsyncpa [#allocation4], 0  ;;  %s563_s0 = inlined_call_operand.hbm [shape: f32[3,2,256], index: 0, kind: input, shape index: {}]   ;;  %s564_s1 = inlined_call_operand.hbm [shape: f32[3,2,256], index: 1, kind: input, shape index: {}]   ;;  %s565_s2 = inlined_call_operand.vmem [shape: f32[2,256], index: 2, kind: input, shape index: {}]   ;;  %s566_s3 = inlined_call_operand.hbm [shape: f32[1,2,128], index: 3, kind: output, shape index: {}]  }
   0x1   :  { %9 = vsyncpa [#allocation7], 0 }
   0x2   :  { %10 = vsyncpa [#allocation5], 0  ;;  %s463_s12 = smov [#allocation3]   ;;  %s391_s16 = scalar_lea.hbm %s563_s0, 192 }
   0x3   :  { %s20_s13 = sshll.u32 %s463_s12, 4  ;;  %p392_p0 = scmp.ne.s32.totalorder %s563_s0, %s391_s16  ;;  %s21_s13 = int_to_ptr.vmem [resolvable:$true] %s20_s13 }
   0x4   :  { %p395_p1 = scmp.lt.u32.totalorder %s391_s16, %s563_s0 }
   0x6   :  { %p397_p2 = pnand %p395_p1, %p392_p0 }
   0x8   :  { %400 = shalt.err (!%p397_p2)
}
   0x9   :  { %s401_s21 = scalar_lea.vmem %s21_s13, 192  ;;  %p406_p4 = scmp.lt.s32.totalorder %s21_s13, %s21_s13 }
   0xa   :  { %p402_p3 = scmp.ne.s32.totalorder %s21_s13, %s401_s21  ;;  %p407_p5 = scmp.lt.s32.totalorder %s401_s21, %s401_s21 }
   0xc   :  { %p408_p6 = por %p407_p5, %p406_p4 }
   0xe   :  { %p409_p7 = pnand %p408_p6, %p402_p3 }
  0x10   :  { %412 = shalt.err (!%p409_p7)
}
  0x11   :  { %s464_s22 = smov 64   ;;  %s465_s23 = smov 4  }
  0x12   :  { %26 = dma.hbm_to_vmem [thread:$0]  %s563_s0, 192, %s21_s13, [#allocation4], %s464_s22, %s464_s22, %s465_s23  }
  0x13   :  { %s466_s26 = smov [#allocation6]   ;;  %s413_s30 = scalar_lea.hbm %s564_s1, 192 }
  0x14   :  { %s36_s27 = sshll.u32 %s466_s26, 4  ;;  %p414_p8 = scmp.ne.s32.totalorder %s564_s1, %s413_s30  ;;  %s37_s27 = int_to_ptr.vmem [resolvable:$true] %s36_s27 }
  0x15   :  { %p417_p9 = scmp.lt.u32.totalorder %s413_s30, %s564_s1 }
  0x17   :  { %p419_p10 = pnand %p417_p9, %p414_p8 }
  0x19   :  { %422 = shalt.err (!%p419_p10)
}
  0x1a   :  { %s423_s8 = scalar_lea.vmem %s37_s27, 192  ;;  %p428_p12 = scmp.lt.s32.totalorder %s37_s27, %s37_s27 }
  0x1b   :  { %p424_p11 = scmp.ne.s32.totalorder %s37_s27, %s423_s8  ;;  %p429_p13 = scmp.lt.s32.totalorder %s423_s8, %s423_s8 }
  0x1d   :  { %p430_p0 = por %p429_p13, %p428_p12 }
  0x1f   :  { %p431_p1 = pnand %p430_p0, %p424_p11 }
  0x21   :  { %434 = shalt.err (!%p431_p1)
}
  0x22   :  { %42 = dma.hbm_to_vmem [thread:$0]  %s564_s1, 192, %s37_s27, [#allocation7], %s464_s22, %s464_s22, %s465_s23  }
  0x23   :  { %457 = dma.done.wait [#allocation4], 192  }
  0x24   :  { %458 = vsyncadd [#allocation4], 4294967104 }
  0x25   :  { %459 = dma.done.wait [#allocation7], 192  }
  0x26   :  { %460 = vsyncadd [#allocation7], 4294967104  ;;  %v467_v0 = vmov 0.0   ;;  %v516_v1 = vld [vmem:[%s565_s2] sm:$0xf]  ;;  %vm266_vm0 = vcmask 1041408  }
  0x27   :  { %93 = vst [vmem:[#allocation2 + $0x18] sm:$0x3] %v467_v0  ;;  %81 = vst [vmem:[#allocation2] sm:$0x3] %v467_v0  ;;  %v224_v2 = vld [vmem:[#allocation6] sm:$0xf] }
  0x28   :  { %82 = vst [vmem:[#allocation2 + $0x2] sm:$0x3] %v467_v0  ;;  %83 = vst [vmem:[#allocation2 + $0x4] sm:$0x3] %v467_v0  ;;  %v97_v3 = vld [vmem:[%s565_s2] sm:$0xf]  ;;  %v225_v4 = vmul.f32 %v224_v2, %v516_v1 }
  0x29   :  { %84 = vst [vmem:[#allocation2 + $0x6] sm:$0x3] %v467_v0  ;;  %85 = vst [vmem:[#allocation2 + $0x8] sm:$0x3] %v467_v0  ;;  %v98_v5 = vld [vmem:[#allocation3] sm:$0xf] }
  0x2a   :  { %86 = vst [vmem:[#allocation2 + $0xa] sm:$0x3] %v467_v0  ;;  %87 = vst [vmem:[#allocation2 + $0xc] sm:$0x3] %v467_v0  ;;  %v99_v6 = vmul.f32 %v98_v5, %v97_v3  ;;  %v139_v7 = vld [vmem:[%s565_s2] sm:$0xf] }
  0x2b   :  { %88 = vst [vmem:[#allocation2 + $0xe] sm:$0x3] %v467_v0  ;;  %89 = vst [vmem:[#allocation2 + $0x10] sm:$0x3] %v467_v0  ;;  %v141_v8 = vld [vmem:[#allocation3 + $0x4] sm:$0xf] }
  0x2c   :  { %90 = vst [vmem:[#allocation2 + $0x12] sm:$0x3] %v467_v0  ;;  %91 = vst [vmem:[#allocation2 + $0x14] sm:$0x3] %v467_v0  ;;  %v227_v9 = vrot.slane %v225_v4, 2  ;;  %v142_v11 = vmul.f32 %v141_v8, %v139_v7  ;;  %v243_v13 = vrot.slane %v516_v1, 2 }
  0x2d   :  { %92 = vst [vmem:[#allocation2 + $0x16] sm:$0x3] %v467_v0  ;;  %94 = vst [vmem:[#allocation2 + $0x1a] sm:$0x3] %v467_v0  ;;  %v100_v12 = vld [vmem:[#allocation6] sm:$0xf] }
  0x2e   :  { %95 = vst [vmem:[#allocation2 + $0x1c] sm:$0x3] %v467_v0  ;;  %96 = vst [vmem:[#allocation2 + $0x1e] sm:$0x3] %v467_v0  ;;  %v247_v10 = vld [vmem:[#allocation2 + $0x18] sm:$0x3]  ;;  %v101_v15 = vmul.f32 %v100_v12, %v99_v6  ;;  %v229_v18 = vadd.f32 %v227_v9, %v225_v4  ;;  %v530_v28 = vadd.f32 %v243_v13, %v516_v1 }
  0x2f   :  { %v121_v14 = vrot.slane %v99_v6, 2  ;;  %v181_v16 = vld [vmem:[%s565_s2] sm:$0xf]  ;;  %v183_v17 = vld [vmem:[#allocation3 + $0x8] sm:$0xf]  ;;  %v162_v20 = vrot.slane %v142_v11, 2 }
  0x30   :  { %v136_v19 = vld [vmem:[#allocation2 + $0x6] sm:$0x3]  ;;  %v184_v21 = vmul.f32 %v183_v17, %v181_v16  ;;  %v107_v22 = vld [vmem:[#allocation6 + $0x4] sm:$0xf]  ;;  %v103_v25 = vrot.slane %v101_v15, 2  ;;  %v248_v29 = vadd.f32 %v247_v10, %v229_v18  ;;  %vm330_vm1 = vcmask 7168  }
  0x31   :  { %v123_v23 = vadd.f32 %v121_v14, %v99_v6  ;;  %v108_v26 = vmul.f32 %v107_v22, %v99_v6  ;;  %v114_v27 = vld [vmem:[#allocation6 + $0x8] sm:$0xf]  ;;  %v164_v30 = vadd.f32 %v162_v20, %v142_v11  ;;  %v124_v31 = vld [vmem:[#allocation2] sm:$0x3]  ;;  %v143_v34 = vld [vmem:[#allocation6] sm:$0xf] }
  0x32   :  { %v178_v24 = vld [vmem:[#allocation2 + $0xe] sm:$0x3]  ;;  %v204_v32 = vrot.slane %v184_v21, 2  ;;  %v115_v33 = vmul.f32 %v114_v27, %v99_v6  ;;  %v105_v36 = vadd.f32 %v103_v25, %v101_v15  ;;  %v144_v39 = vmul.f32 %v143_v34, %v142_v11  ;;  %v149_v40 = vld [vmem:[#allocation6 + $0x4] sm:$0xf]  ;;  %s468_s2 = smov [#allocation8]  }
  0x33   :  { %v137_v35 = vadd.f32 %v136_v19, %v123_v23  ;;  %v110_v38 = vrot.slane %v108_v26, 2  ;;  %249 = vst [vmem:[#allocation2 + $0x18] sm:$0x3] %v248_v29  ;;  %v179_v41 = vadd.f32 %v178_v24, %v164_v30  ;;  %v128_v43 = vld [vmem:[#allocation2 + $0x2] sm:$0x3]  ;;  %v150_v45 = vmul.f32 %v149_v40, %v142_v11  ;;  %s369_s17 = sshll.u32 %s468_s2, 4  ;;  %s370_s17 = int_to_ptr.vmem [resolvable:$true] %s369_s17 }
  0x34   :  { %v220_v37 = vld [vmem:[#allocation2 + $0x16] sm:$0x3]  ;;  %v206_v42 = vadd.f32 %v204_v32, %v184_v21  ;;  %v117_v44 = vrot.slane %v115_v33, 2  ;;  %v125_v47 = vadd.f32 %v124_v31, %v105_v36  ;;  %v132_v49 = vld [vmem:[#allocation2 + $0x4] sm:$0x3]  ;;  %v146_v50 = vrot.slane %v144_v39, 2  ;;  %p440_p3 = scmp.lt.s32.totalorder %s370_s17, %s370_s17 }
  0x35   :  { %v155_v46 = vld [vmem:[#allocation6 + $0x8] sm:$0xf]  ;;  %138 = vst [vmem:[#allocation2 + $0x6] sm:$0x3] %v137_v35  ;;  %v112_v48 = vadd.f32 %v110_v38, %v108_v26  ;;  %v185_v52 = vld [vmem:[#allocation6] sm:$0xf] }
  0x36   :  { %v156_v51 = vmul.f32 %v155_v46, %v142_v11  ;;  %180 = vst [vmem:[#allocation2 + $0xe] sm:$0x3] %v179_v41  ;;  %v221_v53 = vadd.f32 %v220_v37, %v206_v42  ;;  %v119_v54 = vadd.f32 %v117_v44, %v115_v33  ;;  %v166_v55 = vld [vmem:[#allocation2 + $0x8] sm:$0x3]  ;;  %v152_v56 = vrot.slane %v150_v45, 2  ;;  %s435_s18 = scalar_lea.vmem %s370_s17, 32 }
  0x37   :  { %v186_v57 = vmul.f32 %v185_v52, %v184_v21  ;;  %v191_v58 = vld [vmem:[#allocation6 + $0x4] sm:$0xf]  ;;  %126 = vst [vmem:[#allocation2] sm:$0x3] %v125_v47  ;;  %v129_v59 = vadd.f32 %v128_v43, %v112_v48  ;;  %v148_v60 = vadd.f32 %v146_v50, %v144_v39  ;;  %v170_v61 = vld [vmem:[#allocation2 + $0xa] sm:$0x3]  ;;  %p436_p2 = scmp.ne.s32.totalorder %s370_s17, %s435_s18  ;;  %p441_p4 = scmp.lt.s32.totalorder %s435_s18, %s435_s18 }
  0x38   :  { %v158_v62 = vrot.slane %v156_v51, 2  ;;  %v192_v63 = vmul.f32 %v191_v58, %v184_v21  ;;  %v197_v0 = vld [vmem:[#allocation6 + $0x8] sm:$0xf]  ;;  %222 = vst [vmem:[#allocation2 + $0x16] sm:$0x3] %v221_v53  ;;  %v133_v2 = vadd.f32 %v132_v49, %v119_v54  ;;  %v154_v3 = vadd.f32 %v152_v56, %v150_v45 }
  0x39   :  { %v174_v4 = vld [vmem:[#allocation2 + $0xc] sm:$0x3]  ;;  %v188_v5 = vrot.slane %v186_v57, 2  ;;  %v198_v6 = vmul.f32 %v197_v0, %v184_v21  ;;  %v230_v7 = vld [vmem:[#allocation6 + $0x4] sm:$0xf]  ;;  %v167_v8 = vadd.f32 %v166_v55, %v148_v60  ;;  %vm332_vm2 = vcmask 15360   ;;  %p442_p5 = por %p441_p4, %p440_p3 }
  0x3a   :  { %130 = vst [vmem:[#allocation2 + $0x2] sm:$0x3] %v129_v59  ;;  %v160_v9 = vadd.f32 %v158_v62, %v156_v51  ;;  %v208_v10 = vld [vmem:[#allocation2 + $0x10] sm:$0x3]  ;;  %v194_v11 = vrot.slane %v192_v63, 2  ;;  %v231_v12 = vmul.f32 %v230_v7, %v516_v1  ;;  %v171_v14 = vadd.f32 %v170_v61, %v154_v3 }
  0x3b   :  { %v236_v13 = vld [vmem:[#allocation6 + $0x8] sm:$0xf]  ;;  %134 = vst [vmem:[#allocation2 + $0x4] sm:$0x3] %v133_v2  ;;  %v190_v15 = vadd.f32 %v188_v5, %v186_v57  ;;  %v212_v16 = vld [vmem:[#allocation2 + $0x12] sm:$0x3]  ;;  %p443_p6 = pnand %p442_p5, %p436_p2 }
  0x3c   :  { %v200_v17 = vrot.slane %v198_v6, 2  ;;  %v237_v18 = vmul.f32 %v236_v13, %v516_v1  ;;  %v259_v19 = vld [vmem:[#allocation2 + $0x1e] sm:$0x3]  ;;  %v314_v20 = vld [vmem:[#allocation2 + $0x18] sm:$0x3]  ;;  %v175_v21 = vadd.f32 %v174_v4, %v160_v9  ;;  %v196_v22 = vadd.f32 %v194_v11, %v192_v63 }
  0x3d   :  { %168 = vst [vmem:[#allocation2 + $0x8] sm:$0x3] %v167_v8  ;;  %v216_v23 = vld [vmem:[#allocation2 + $0x14] sm:$0x3]  ;;  %v233_v24 = vrot.slane %v231_v12, 2  ;;  %v260_v25 = vadd.f32 %v259_v19, %v530_v28  ;;  %v315_v26 = vsel %vm266_vm0, %v314_v20, 0.0  ;;  %v209_v29 = vadd.f32 %v208_v10, %v190_v15 }
  0x3e   :  { %v278_v27 = vld [vmem:[#allocation2 + $0x6] sm:$0x3]  ;;  %172 = vst [vmem:[#allocation2 + $0xa] sm:$0x3] %v171_v14  ;;  %v202_v30 = vadd.f32 %v200_v17, %v198_v6  ;;  %v251_v31 = vld [vmem:[#allocation2 + $0x1a] sm:$0x3]  ;;  %316 = vadd.xlane.f32.xlu0 %v315_v26  ;;  %v213_v34 = vadd.f32 %v212_v16, %v196_v22 }
  0x3f   :  { %v239_v32 = vrot.slane %v237_v18, 2  ;;  %v279_v1 = vsel %vm266_vm0, %v278_v27, 0.0  ;;  %v294_v33 = vld [vmem:[#allocation2 + $0xe] sm:$0x3]  ;;  %176 = vst [vmem:[#allocation2 + $0xc] sm:$0x3] %v175_v21  ;;  %v235_v35 = vadd.f32 %v233_v24, %v231_v12 }
  0x40   :  { %v255_v36 = vld [vmem:[#allocation2 + $0x1c] sm:$0x3]  ;;  %261 = vst [vmem:[#allocation2 + $0x1e] sm:$0x3] %v260_v25  ;;  %280 = vadd.xlane.f32.xlu1 %v279_v1  ;;  %v265_v37 = vld [vmem:[#allocation2] sm:$0x3]  ;;  %v217_v28 = vadd.f32 %v216_v23, %v202_v30 }
  0x41   :  { %210 = vst [vmem:[#allocation2 + $0x10] sm:$0x3] %v209_v29  ;;  %v241_v38 = vadd.f32 %v239_v32, %v237_v18  ;;  %v295_v39 = vsel %vm266_vm0, %v294_v33, 0.0  ;;  %v267_v40 = vsel %vm266_vm0, %v265_v37, 0.0  ;;  %214 = vst [vmem:[#allocation2 + $0x12] sm:$0x3] %v213_v34  ;;  %v252_v41 = vadd.f32 %v251_v31, %v235_v35 }
  0x42   :  { %v310_v42 = vld [vmem:[#allocation2 + $0x16] sm:$0x3]  ;;  %v270_v43 = vld [vmem:[#allocation2 + $0x2] sm:$0x3]  ;;  %218 = vst [vmem:[#allocation2 + $0x14] sm:$0x3] %v217_v28  ;;  %268 = vadd.xlane.f32.xlu0 %v267_v40 }
  0x43   :  { %v256_v44 = vadd.f32 %v255_v36, %v241_v38  ;;  %253 = vst [vmem:[#allocation2 + $0x1a] sm:$0x3] %v252_v41  ;;  %v271_v45 = vsel %vm266_vm0, %v270_v43, 0.0  ;;  %v311_v46 = vsel %vm266_vm0, %v310_v42, 0.0  ;;  %v274_v48 = vld [vmem:[#allocation2 + $0x4] sm:$0x3] }
  0x44   :  { %296 = vadd.xlane.f32.xlu1 %v295_v39  ;;  %v282_v47 = vld [vmem:[#allocation2 + $0x8] sm:$0x3]  ;;  %v275_v50 = vsel %vm266_vm0, %v274_v48, 0.0  ;;  %vm334_vm3 = vcmask 23552   ;;  %vm336_vm4 = vcmask 31744   ;;  %vm338_vm5 = vcmask 39936  }
  0x45   :  { %257 = vst [vmem:[#allocation2 + $0x1c] sm:$0x3] %v256_v44  ;;  %v283_v49 = vsel %vm266_vm0, %v282_v47, 0.0  ;;  %v286_v52 = vld [vmem:[#allocation2 + $0xa] sm:$0x3]  ;;  %vm340_vm6 = vcmask 48128  }
  0x46   :  { %272 = vadd.xlane.f32.xlu0 %v271_v45  ;;  %v290_v51 = vld [vmem:[#allocation2 + $0xc] sm:$0x3]  ;;  %v287_v54 = vsel %vm266_vm0, %v286_v52, 0.0  ;;  %vm342_vm7 = vcmask 56320   ;;  %vm344_vm8 = vcmask 64512   ;;  %vm346_vm9 = vcmask 72704  }
  0x47   :  { %v291_v53 = vsel %vm266_vm0, %v290_v51, 0.0  ;;  %v326_v0 = vld [vmem:[#allocation2 + $0x1e] sm:$0x3]  ;;  %vm348_vm10 = vcmask 80896   ;;  %vm350_vm11 = vcmask 89088   ;;  %vm352_vm12 = vcmask 97280  }
  0x48   :  { %312 = vadd.xlane.f32.xlu1 %v311_v46  ;;  %v298_v55 = vld [vmem:[#allocation2 + $0x10] sm:$0x3]  ;;  %v302_v56 = vld [vmem:[#allocation2 + $0x12] sm:$0x3]  ;;  %v327_v3 = vsel %vm266_vm0, %v326_v0, 0.0  ;;  %vm354_vm13 = vcmask 105472  }
  0x49   :  { %v299_v57 = vsel %vm266_vm0, %v298_v55, 0.0  ;;  %v303_v58 = vsel %vm266_vm0, %v302_v56, 0.0  ;;  %v306_v59 = vld [vmem:[#allocation2 + $0x14] sm:$0x3]  ;;  %vm356_vm14 = vcmask 113664   ;;  %vm358_vm15 = vcmask 121856  }
  0x4a   :  { %284 = vadd.xlane.f32.xlu0 %v283_v49  ;;  %v318_v60 = vld [vmem:[#allocation2 + $0x1a] sm:$0x3]  ;;  %v307_v61 = vsel %vm266_vm0, %v306_v59, 0.0 }
  0x4b   :  { %v319_v62 = vsel %vm266_vm0, %v318_v60, 0.0 }
  0x4c   :  { %276 = vadd.xlane.f32.xlu1 %v275_v50  ;;  %v322_v63 = vld [vmem:[#allocation2 + $0x1c] sm:$0x3] }
  0x4d   :  { %v323_v2 = vsel %vm266_vm0, %v322_v63, 0.0  ;;  %vm360_vm0 = vcmask 130048  }
  0x4e   :  { %292 = vadd.xlane.f32.xlu0 %v291_v53 }
  0x50   :  { %288 = vadd.xlane.f32.xlu1 %v287_v54 }
  0x52   :  { %300 = vadd.xlane.f32.xlu0 %v299_v57 }
  0x54   :  { %304 = vadd.xlane.f32.xlu1 %v303_v58 }
  0x56   :  { %308 = vadd.xlane.f32.xlu0 %v307_v61 }
  0x58   :  { %320 = vadd.xlane.f32.xlu1 %v319_v62 }
  0x5a   :  { %324 = vadd.xlane.f32.xlu0 %v323_v2 }
  0x5c   :  { %328 = vadd.xlane.f32.xlu1 %v327_v3 }
  0xcb   :  { %v317_v4 = vpop.xlane.xlu0 %316 }
  0xcd   :  { %v281_v5 = vpop.xlane.xlu1 %280 }
  0xcf   :  { %v269_v6 = vpop.xlane.xlu0 %268 }
  0xd1   :  { %v297_v7 = vpop.xlane.xlu1 %296 }
  0xd3   :  { %v273_v8 = vpop.xlane.xlu0 %272 }
  0xd4   :  { %v331_v11 = vsel %vm330_vm1, %v269_v6, %v273_v8 }
  0xd5   :  { %v313_v9 = vpop.xlane.xlu1 %312 }
  0xd7   :  { %v285_v10 = vpop.xlane.xlu0 %284 }
  0xd9   :  { %v277_v12 = vpop.xlane.xlu1 %276 }
  0xda   :  { %v333_v13 = vsel %vm332_vm2, %v331_v11, %v277_v12 }
  0xdb   :  { %v335_v14 = vsel %vm334_vm3, %v333_v13, %v281_v5  ;;  %v293_v16 = vpop.xlane.xlu0 %292 }
  0xdc   :  { %v337_v15 = vsel %vm336_vm4, %v335_v14, %v285_v10 }
  0xdd   :  { %v289_v17 = vpop.xlane.xlu1 %288 }
  0xde   :  { %v339_v18 = vsel %vm338_vm5, %v337_v15, %v289_v17 }
  0xdf   :  { %v341_v19 = vsel %vm340_vm6, %v339_v18, %v293_v16  ;;  %v301_v21 = vpop.xlane.xlu0 %300 }
  0xe0   :  { %v343_v20 = vsel %vm342_vm7, %v341_v19, %v297_v7 }
  0xe1   :  { %v345_v22 = vsel %vm344_vm8, %v343_v20, %v301_v21  ;;  %v305_v23 = vpop.xlane.xlu1 %304 }
  0xe2   :  { %v347_v24 = vsel %vm346_vm9, %v345_v22, %v305_v23 }
  0xe3   :  { %v309_v25 = vpop.xlane.xlu0 %308 }
  0xe4   :  { %v349_v26 = vsel %vm348_vm10, %v347_v24, %v309_v25 }
  0xe5   :  { %v321_v27 = vpop.xlane.xlu1 %320  ;;  %v351_v29 = vsel %vm350_vm11, %v349_v26, %v313_v9 }
  0xe6   :  { %v353_v30 = vsel %vm352_vm12, %v351_v29, %v317_v4 }
  0xe7   :  { %v355_v31 = vsel %vm354_vm13, %v353_v30, %v321_v27  ;;  %v325_v32 = vpop.xlane.xlu0 %324 }
  0xe8   :  { %v357_v1 = vsel %vm356_vm14, %v355_v31, %v325_v32 }
  0xe9   :  { %v329_v33 = vpop.xlane.xlu1 %328 }
  0xea   :  { %v359_v34 = vsel %vm358_vm15, %v357_v1, %v329_v33 }
  0xeb   :  { %v361_v35 = vsel %vm360_vm0, %v359_v34, 0.0 }
  0xec   :  { %362 = vst [vmem:[#allocation8] sm:$0x3] %v361_v35 }
  0xed   :  { %446 = shalt.err (!%p443_p6)
}
  0xee   :  { %s447_s21 = scalar_lea.hbm %s566_s3, 32 }
  0xef   :  { %p448_p7 = scmp.ne.s32.totalorder %s566_s3, %s447_s21  ;;  %p451_p8 = scmp.lt.u32.totalorder %s447_s21, %s566_s3 }
  0xf1   :  { %p453_p9 = pnand %p451_p8, %p448_p7 }
  0xf3   :  { %456 = shalt.err (!%p453_p9)
}
  0xf4   :  { %372 = dma.vmem_to_hbm [thread:$0]  %s370_s17, 32, %s566_s3, [#allocation5]  }
  0xf5   :  { %461 = dma.done.wait [#allocation5], 32  }
  0xf6   :  { %462 = vsyncadd [#allocation5], 4294967264 }
  0xf7   :  { %376 = vsyncpa [#allocation4], 1 }
  0xf8   :  { %377 = vsyncpa [#allocation7], 1 }
  0xf9   :  { %378 = vsyncpa [#allocation5], 1 }

</bundles_post_ra>
